<compile_context>
chip_gen: v6e
topology: v6e:2x2x1
jax: 0.10.0
libtpu: 0.0.40
codegen_flags: <defaults>
</compile_context>

<pallas_src>
import functools

import jax
import jax.numpy as jnp
import numpy as np
from jax.experimental import pallas as pl
from jax.experimental.pallas import tpu as pltpu

_LN_EPS = 1e-5
_VMEM_LIMIT = 48 * 1024 * 1024   # headroom under v7x's 64 MiB physical VMEM


def _layer_norm(h, g, b, inv_e):
    # single pass: reuse (h - mu); multiply by 1/E instead of jnp.mean
    mu = jnp.sum(h, axis=-1, keepdims=True) * inv_e
    d = h - mu
    var = jnp.sum(d * d, axis=-1, keepdims=True) * inv_e
    return d * jax.lax.rsqrt(var + _LN_EPS) * g + b


# ---------------------------------------------------------------------------
# Fused path: one grid step per batch element, x read from HBM exactly once.
# ---------------------------------------------------------------------------
def fused_layer_kernel(x_ref, wv_ref, bv_ref, wo_ref, bo_ref,
                       g1_ref, be1_ref, w1_ref, bf1_ref,
                       w2_ref, bf2_ref, g2_ref, be2_ref, o_ref, *, seq_len):
    x = x_ref[0].astype(jnp.float32)                      # (S, E)
    inv_e = 1.0 / x.shape[-1]                             # static, folded

    # attention row (broadcast over the sequence):
    #   ((sum_s x[s,:]) @ Wv + S*bv) @ Wo + bo
    xsum = jnp.sum(x, axis=0, keepdims=True)              # (1, E)
    v_sum = (jnp.dot(xsum, wv_ref[...], preferred_element_type=jnp.float32)
             + jnp.float32(seq_len) * bv_ref[...])
    attn_row = (jnp.dot(v_sum, wo_ref[...], preferred_element_type=jnp.float32)
                + bo_ref[...])                            # (1, E)

    # TODO(synk): dropout treated as identity (inference mode); no in-kernel RNG.
    x1 = _layer_norm(x + attn_row, g1_ref[...], be1_ref[...], inv_e)
    f = jnp.dot(x1, w1_ref[...], preferred_element_type=jnp.float32) + bf1_ref[...]
    f = jnp.maximum(f, 0.0)
    ffn = jnp.dot(f, w2_ref[...], preferred_element_type=jnp.float32) + bf2_ref[...]
    x2 = _layer_norm(x1 + ffn, g2_ref[...], be2_ref[...], inv_e)
    o_ref[0] = x2.astype(o_ref.dtype)


# ---------------------------------------------------------------------------
# Tiled path, pass 1: per-batch attention row.
#   row[b, :] = ((sum_s x[b, s, :]) @ Wv + S * bv) @ Wo + bo
# grid = (B, S_tiles); the sequence axis is a reduction accumulated in VMEM
# scratch (init at j==0, finalize + single writeback at the last tile).
# ---------------------------------------------------------------------------
def attn_row_kernel(x_ref, wv_ref, bv_ref, wo_ref, bo_ref, row_ref, acc_ref,
                    *, seq_len):
    j = pl.program_id(1)

    @pl.when(j == 0)
    def _init():
        acc_ref[...] = jnp.zeros_like(acc_ref)

    acc_ref[...] += jnp.sum(x_ref[0].astype(jnp.float32), axis=0, keepdims=True)

    @pl.when(j == pl.num_programs(1) - 1)
    def _finalize():
        v_sum = (jnp.dot(acc_ref[...], wv_ref[...],
                         preferred_element_type=jnp.float32)
                 + jnp.float32(seq_len) * bv_ref[...])                 # (1, E)
        row = (jnp.dot(v_sum, wo_ref[...], preferred_element_type=jnp.float32)
               + bo_ref[...])                                          # (1, E)
        row_ref[0] = row.astype(row_ref.dtype)


# ---------------------------------------------------------------------------
# Tiled path, pass 2: residual + LN1 + FFN + residual + LN2 on (b, seq-tile).
# ---------------------------------------------------------------------------
def layer_tile_kernel(x_ref, row_ref, g1_ref, be1_ref, w1_ref, bf1_ref,
                      w2_ref, bf2_ref, g2_ref, be2_ref, o_ref):
    x = x_ref[0].astype(jnp.float32)          # (tS, E)
    attn_row = row_ref[0]                     # (1, E) -> broadcast over sequence
    inv_e = 1.0 / x.shape[-1]

    # TODO(synk): dropout treated as identity (inference mode).
    x1 = _layer_norm(x + attn_row, g1_ref[...], be1_ref[...], inv_e)
    f = jnp.dot(x1, w1_ref[...], preferred_element_type=jnp.float32) + bf1_ref[...]
    f = jnp.maximum(f, 0.0)
    ffn = jnp.dot(f, w2_ref[...], preferred_element_type=jnp.float32) + bf2_ref[...]
    x2 = _layer_norm(x1 + ffn, g2_ref[...], be2_ref[...], inv_e)
    o_ref[0] = x2.astype(o_ref.dtype)


def _fused_fits(S, E, F, budget_bytes):
    weights = 4 * (2 * E * E + E * F + F * E + 6 * E + F)
    x_blk = 4 * S * E
    out_blk = 4 * S * E
    live = 4 * (S * F + 4 * S * E)       # FFN intermediate + fp32 temporaries
    total = 2 * (x_blk + out_blk + weights) + live   # double-buffered I/O
    return total <= budget_bytes


def transformer_layer(x, params, num_heads, *, seq_tile=None, force_tiled=False):
    B, S, E = x.shape
    assert E % num_heads == 0            # API parity with the PyTorch module
    F = params["w1"].shape[1]

    # Only the V slice of the fused QKV weight feeds the output (Q/K are dead
    # under the reference einsum). Slice once in the wrapper -> lane-aligned (E,E).
    wv = params["wqkv"][:, 2 * E:3 * E]
    bv = params["bqkv"][:, 2 * E:3 * E]

    use_fused = (not force_tiled and seq_tile is None
                 and _fused_fits(S, E, F, int(0.6 * _VMEM_LIMIT)))

    if use_fused:
        return pl.pallas_call(
            functools.partial(fused_layer_kernel, seq_len=S),
            out_shape=jax.ShapeDtypeStruct((B, S, E), x.dtype),
            grid_spec=pltpu.PrefetchScalarGridSpec(
                num_scalar_prefetch=0,
                grid=(B,),
                in_specs=[
                    pl.BlockSpec((1, S, E), lambda b: (b, 0, 0)),   # x
                    pl.BlockSpec((E, E), lambda b: (0, 0)),         # Wv
                    pl.BlockSpec((1, E), lambda b: (0, 0)),         # bv
                    pl.BlockSpec((E, E), lambda b: (0, 0)),         # Wo
                    pl.BlockSpec((1, E), lambda b: (0, 0)),         # bo
                    pl.BlockSpec((1, E), lambda b: (0, 0)),         # LN1 gamma
                    pl.BlockSpec((1, E), lambda b: (0, 0)),         # LN1 beta
                    pl.BlockSpec((E, F), lambda b: (0, 0)),         # W1
                    pl.BlockSpec((1, F), lambda b: (0, 0)),         # b1
                    pl.BlockSpec((F, E), lambda b: (0, 0)),         # W2
                    pl.BlockSpec((1, E), lambda b: (0, 0)),         # b2
                    pl.BlockSpec((1, E), lambda b: (0, 0)),         # LN2 gamma
                    pl.BlockSpec((1, E), lambda b: (0, 0)),         # LN2 beta
                ],
                out_specs=pl.BlockSpec((1, S, E), lambda b: (b, 0, 0)),
            ),
            compiler_params=pltpu.CompilerParams(
                dimension_semantics=("parallel",),
                vmem_limit_bytes=_VMEM_LIMIT),
        )(x, wv, bv, params["wo"], params["bo"],
          params["g1"], params["be1"], params["w1"], params["bf1"],
          params["w2"], params["bf2"], params["g2"], params["be2"])

    # ---- tiled fallback ------------------------------------------------------
    if seq_tile is None:
        seq_tile = S
        for cand in (1024, 512, 256, 128, 64, 32, 16, 8):
            if S % cand == 0:
                seq_tile = cand
                break
    assert S % seq_tile == 0 and (seq_tile == S or seq_tile % 8 == 0)
    n_s = S // seq_tile

    # ---- pass 1: per-batch attention row ------------------------------------
    attn_rows = pl.pallas_call(
        functools.partial(attn_row_kernel, seq_len=S),
        out_shape=jax.ShapeDtypeStruct((B, 1, E), jnp.float32),
        grid_spec=pltpu.PrefetchScalarGridSpec(
            num_scalar_prefetch=0,
            grid=(B, n_s),
            in_specs=[
                pl.BlockSpec((1, seq_tile, E), lambda b, j: (b, j, 0)),  # x tile
                pl.BlockSpec((E, E), lambda b, j: (0, 0)),               # Wv
                pl.BlockSpec((1, E), lambda b, j: (0, 0)),               # bv
                pl.BlockSpec((E, E), lambda b, j: (0, 0)),               # Wo
                pl.BlockSpec((1, E), lambda b, j: (0, 0)),               # bo
            ],
            out_specs=pl.BlockSpec((1, 1, E), lambda b, j: (b, 0, 0)),
            scratch_shapes=[pltpu.VMEM((1, E), jnp.float32)],
        ),
        compiler_params=pltpu.CompilerParams(
            dimension_semantics=("parallel", "arbitrary"),
            vmem_limit_bytes=_VMEM_LIMIT),
    )(x, wv, bv, params["wo"], params["bo"])

    # ---- pass 2: residual + LN + FFN + residual + LN, S-tiled ----------------
    out = pl.pallas_call(
        layer_tile_kernel,
        out_shape=jax.ShapeDtypeStruct((B, S, E), x.dtype),
        grid_spec=pltpu.PrefetchScalarGridSpec(
            num_scalar_prefetch=0,
            grid=(B, n_s),
            in_specs=[
                pl.BlockSpec((1, seq_tile, E), lambda b, j: (b, j, 0)),  # x tile
                pl.BlockSpec((1, 1, E), lambda b, j: (b, 0, 0)),         # attn row
                pl.BlockSpec((1, E), lambda b, j: (0, 0)),               # LN1 gamma
                pl.BlockSpec((1, E), lambda b, j: (0, 0)),               # LN1 beta
                pl.BlockSpec((E, F), lambda b, j: (0, 0)),               # W1
                pl.BlockSpec((1, F), lambda b, j: (0, 0)),               # b1
                pl.BlockSpec((F, E), lambda b, j: (0, 0)),               # W2
                pl.BlockSpec((1, E), lambda b, j: (0, 0)),               # b2
                pl.BlockSpec((1, E), lambda b, j: (0, 0)),               # LN2 gamma
                pl.BlockSpec((1, E), lambda b, j: (0, 0)),               # LN2 beta
            ],
            out_specs=pl.BlockSpec((1, seq_tile, E), lambda b, j: (b, j, 0)),
        ),
        compiler_params=pltpu.CompilerParams(
            dimension_semantics=("parallel", "parallel"),   # tiles independent
            vmem_limit_bytes=_VMEM_LIMIT),
    )(x, attn_rows, params["g1"], params["be1"], params["w1"], params["bf1"],
      params["w2"], params["bf2"], params["g2"], params["be2"])

    return out


def reference(x, p, num_heads):
    """Pure-JAX mirror of the PyTorch forward (dropout = identity)."""
    B, S, E = x.shape
    D = E // num_heads
    qkv = x @ p["wqkv"] + p["bqkv"][0]
    qkv = qkv.reshape(B, S, 3, num_heads, D).transpose(2, 0, 3, 1, 4)
    q, k, v = qkv[0], qkv[1], qkv[2]
    energy = jnp.einsum("bhqd,bhkd->bhqk", q, k)
    attn = jax.nn.softmax(energy / jnp.sqrt(jnp.float32(D)), axis=-1)
    out = jnp.einsum("bhqk,bhvd->bhqd", attn, v)   # degenerate contraction, as in PyTorch
    out = out.transpose(0, 2, 1, 3).reshape(B, S, E)
    attn_out = out @ p["wo"] + p["bo"][0]

    def ln(h, g, b):
        mu = h.mean(-1, keepdims=True)
        var = ((h - mu) ** 2).mean(-1, keepdims=True)
        return (h - mu) / jnp.sqrt(var + _LN_EPS) * g[0] + b[0]

    x1 = ln(x + attn_out, p["g1"], p["be1"])
    f = jax.nn.relu(x1 @ p["w1"] + p["bf1"][0])
    x2 = ln(x1 + (f @ p["w2"] + p["bf2"][0]), p["g2"], p["be2"])
    return x2


if __name__ == "__main__":
    B, S, E, H, F = 2, 16, 32, 4, 64   # batch, seq, embed_dim, num_heads, ff_hidden_dim

    key = jax.random.PRNGKey(0)
    keys = jax.random.split(key, 13)
    init = lambda k, shape, s=0.1: (s * jax.random.normal(k, shape)).astype(jnp.float32)

    params = {
        "wqkv": init(keys[0], (E, 3 * E)),
        "bqkv": init(keys[1], (1, 3 * E)),
        "wo":   init(keys[2], (E, E)),
        "bo":   init(keys[3], (1, E)),
        "g1":   jnp.ones((1, E), jnp.float32) + init(keys[4], (1, E), 0.05),
        "be1":  init(keys[5], (1, E), 0.05),
        "w1":   init(keys[6], (E, F)),
        "bf1":  init(keys[7], (1, F)),
        "w2":   init(keys[8], (F, E)),
        "bf2":  init(keys[9], (1, E)),
        "g2":   jnp.ones((1, E), jnp.float32) + init(keys[10], (1, E), 0.05),
        "be2":  init(keys[11], (1, E), 0.05),
    }

    x = jax.random.normal(keys[12], (B, S, E), dtype=jnp.float32)

    ref = jax.block_until_ready(reference(x, params, H))

    # Fused single-read path (default for shapes that fit in VMEM).
    out_fused = jax.block_until_ready(transformer_layer(x, params, num_heads=H))
    np.testing.assert_allclose(np.asarray(out_fused), np.asarray(ref),
                               rtol=2e-3, atol=2e-3)

    # Sequence-tiled two-pass path (used for long sequences).
    out_tiled = jax.block_until_ready(
        transformer_layer(x, params, num_heads=H, seq_tile=8))
    np.testing.assert_allclose(np.asarray(out_tiled), np.asarray(ref),
                               rtol=2e-3, atol=2e-3)

    print("KERNEL_OK")
</pallas_src>

<mosaic_0001>
module attributes {stable_mosaic.version = 11 : i64} {
  func.func @fused_layer_kernel(%arg0: i32, %arg1: memref<1x16x32xf32, #tpu.memory_space<vmem>>, %arg2: memref<32x32xf32, #tpu.memory_space<vmem>>, %arg3: memref<1x32xf32, #tpu.memory_space<vmem>>, %arg4: memref<32x32xf32, #tpu.memory_space<vmem>>, %arg5: memref<1x32xf32, #tpu.memory_space<vmem>>, %arg6: memref<1x32xf32, #tpu.memory_space<vmem>>, %arg7: memref<1x32xf32, #tpu.memory_space<vmem>>, %arg8: memref<32x64xf32, #tpu.memory_space<vmem>>, %arg9: memref<1x64xf32, #tpu.memory_space<vmem>>, %arg10: memref<64x32xf32, #tpu.memory_space<vmem>>, %arg11: memref<1x32xf32, #tpu.memory_space<vmem>>, %arg12: memref<1x32xf32, #tpu.memory_space<vmem>>, %arg13: memref<1x32xf32, #tpu.memory_space<vmem>>, %arg14: memref<1x16x32xf32, #tpu.memory_space<vmem>>) attributes {dimension_semantics = [#tpu.dimension_semantics<parallel>], iteration_bounds = array<i64: 2>, scalar_prefetch = 0 : i64, scratch_operands = 0 : i64, tpu.core_type = #tpu.core_type<tc>, window_params = [{transform_indices = @transform_0, window_bounds = array<i64: 1, 16, 32>}, {pipeline_mode = #tpu.pipeline_mode<synchronous>, transform_indices = @transform_1, window_bounds = array<i64: 32, 32>}, {pipeline_mode = #tpu.pipeline_mode<synchronous>, transform_indices = @transform_2, window_bounds = array<i64: 1, 32>}, {pipeline_mode = #tpu.pipeline_mode<synchronous>, transform_indices = @transform_3, window_bounds = array<i64: 32, 32>}, {pipeline_mode = #tpu.pipeline_mode<synchronous>, transform_indices = @transform_4, window_bounds = array<i64: 1, 32>}, {pipeline_mode = #tpu.pipeline_mode<synchronous>, transform_indices = @transform_5, window_bounds = array<i64: 1, 32>}, {pipeline_mode = #tpu.pipeline_mode<synchronous>, transform_indices = @transform_6, window_bounds = array<i64: 1, 32>}, {pipeline_mode = #tpu.pipeline_mode<synchronous>, transform_indices = @transform_7, window_bounds = array<i64: 32, 64>}, {pipeline_mode = #tpu.pipeline_mode<synchronous>, transform_indices = @transform_8, window_bounds = array<i64: 1, 64>}, {pipeline_mode = #tpu.pipeline_mode<synchronous>, transform_indices = @transform_9, window_bounds = array<i64: 64, 32>}, {pipeline_mode = #tpu.pipeline_mode<synchronous>, transform_indices = @transform_10, window_bounds = array<i64: 1, 32>}, {pipeline_mode = #tpu.pipeline_mode<synchronous>, transform_indices = @transform_11, window_bounds = array<i64: 1, 32>}, {pipeline_mode = #tpu.pipeline_mode<synchronous>, transform_indices = @transform_12, window_bounds = array<i64: 1, 32>}, {transform_indices = @transform_13, window_bounds = array<i64: 1, 16, 32>}]} {
    %c0 = arith.constant 0 : index
    %c0_0 = arith.constant 0 : index
    %c0_1 = arith.constant 0 : index
    %0 = vector.load %arg1[%c0, %c0_0, %c0_1] : memref<1x16x32xf32, #tpu.memory_space<vmem>>, vector<1x16x32xf32>
    %1 = vector.shape_cast %0 : vector<1x16x32xf32> to vector<16x32xf32>
    %cst = arith.constant dense<0.000000e+00> : vector<32xf32>
    %2 = vector.multi_reduction <add>, %1, %cst [0] : vector<16x32xf32> to vector<32xf32>
    %3 = vector.shape_cast %2 : vector<32xf32> to vector<1x32xf32>
    %c0_2 = arith.constant 0 : index
    %c0_3 = arith.constant 0 : index
    %4 = vector.load %arg2[%c0_2, %c0_3] : memref<32x32xf32, #tpu.memory_space<vmem>>, vector<32x32xf32>
    %cst_4 = arith.constant dense<0.000000e+00> : vector<1x32xf32>
    %5 = tpu.matmul %3, %4, %cst_4 {dimension_numbers = #tpu.dot_dimension_numbers<[1], [0], [0], [1], [0, 0, 1, 1], [], []>} : vector<1x32xf32>, vector<32x32xf32>, vector<1x32xf32> -> vector<1x32xf32>
    %c0_5 = arith.constant 0 : index
    %c0_6 = arith.constant 0 : index
    %6 = vector.load %arg3[%c0_5, %c0_6] : memref<1x32xf32, #tpu.memory_space<vmem>>, vector<1x32xf32>
    %cst_7 = arith.constant 1.600000e+01 : f32
    %7 = vector.broadcast %cst_7 : f32 to vector<1x32xf32>
    %8 = arith.mulf %7, %6 : vector<1x32xf32>
    %9 = arith.addf %5, %8 : vector<1x32xf32>
    %c0_8 = arith.constant 0 : index
    %c0_9 = arith.constant 0 : index
    %10 = vector.load %arg4[%c0_8, %c0_9] : memref<32x32xf32, #tpu.memory_space<vmem>>, vector<32x32xf32>
    %cst_10 = arith.constant dense<0.000000e+00> : vector<1x32xf32>
    %11 = tpu.matmul %9, %10, %cst_10 {dimension_numbers = #tpu.dot_dimension_numbers<[1], [0], [0], [1], [0, 0, 1, 1], [], []>} : vector<1x32xf32>, vector<32x32xf32>, vector<1x32xf32> -> vector<1x32xf32>
    %c0_11 = arith.constant 0 : index
    %c0_12 = arith.constant 0 : index
    %12 = vector.load %arg5[%c0_11, %c0_12] : memref<1x32xf32, #tpu.memory_space<vmem>>, vector<1x32xf32>
    %13 = arith.addf %11, %12 : vector<1x32xf32>
    %14 = vector.broadcast %13 : vector<1x32xf32> to vector<16x32xf32>
    %15 = arith.addf %1, %14 : vector<16x32xf32>
    %c0_13 = arith.constant 0 : index
    %c0_14 = arith.constant 0 : index
    %16 = vector.load %arg6[%c0_13, %c0_14] : memref<1x32xf32, #tpu.memory_space<vmem>>, vector<1x32xf32>
    %c0_15 = arith.constant 0 : index
    %c0_16 = arith.constant 0 : index
    %17 = vector.load %arg7[%c0_15, %c0_16] : memref<1x32xf32, #tpu.memory_space<vmem>>, vector<1x32xf32>
    %cst_17 = arith.constant dense<0.000000e+00> : vector<16xf32>
    %18 = vector.multi_reduction <add>, %15, %cst_17 [1] : vector<16x32xf32> to vector<16xf32>
    %19 = vector.shape_cast %18 : vector<16xf32> to vector<16x1xf32>
    %cst_18 = arith.constant 3.125000e-02 : f32
    %20 = vector.broadcast %cst_18 : f32 to vector<16x1xf32>
    %21 = arith.mulf %19, %20 : vector<16x1xf32>
    %22 = vector.broadcast %21 : vector<16x1xf32> to vector<16x32xf32>
    %23 = arith.subf %15, %22 : vector<16x32xf32>
    %24 = arith.mulf %23, %23 : vector<16x32xf32>
    %cst_19 = arith.constant dense<0.000000e+00> : vector<16xf32>
    %25 = vector.multi_reduction <add>, %24, %cst_19 [1] : vector<16x32xf32> to vector<16xf32>
    %26 = vector.shape_cast %25 : vector<16xf32> to vector<16x1xf32>
    %cst_20 = arith.constant 3.125000e-02 : f32
    %27 = vector.broadcast %cst_20 : f32 to vector<16x1xf32>
    %28 = arith.mulf %26, %27 : vector<16x1xf32>
    %cst_21 = arith.constant 9.99999974E-6 : f32
    %29 = vector.broadcast %cst_21 : f32 to vector<16x1xf32>
    %30 = arith.addf %28, %29 : vector<16x1xf32>
    %31 = math.rsqrt %30 : vector<16x1xf32>
    %32 = vector.broadcast %31 : vector<16x1xf32> to vector<16x32xf32>
    %33 = arith.mulf %23, %32 : vector<16x32xf32>
    %34 = vector.broadcast %16 : vector<1x32xf32> to vector<16x32xf32>
    %35 = arith.mulf %33, %34 : vector<16x32xf32>
    %36 = vector.broadcast %17 : vector<1x32xf32> to vector<16x32xf32>
    %37 = arith.addf %35, %36 : vector<16x32xf32>
    %c0_22 = arith.constant 0 : index
    %c0_23 = arith.constant 0 : index
    %38 = vector.load %arg8[%c0_22, %c0_23] : memref<32x64xf32, #tpu.memory_space<vmem>>, vector<32x64xf32>
    %cst_24 = arith.constant dense<0.000000e+00> : vector<16x64xf32>
    %39 = tpu.matmul %37, %38, %cst_24 {dimension_numbers = #tpu.dot_dimension_numbers<[1], [0], [0], [1], [0, 0, 1, 1], [], []>} : vector<16x32xf32>, vector<32x64xf32>, vector<16x64xf32> -> vector<16x64xf32>
    %c0_25 = arith.constant 0 : index
    %c0_26 = arith.constant 0 : index
    %40 = vector.load %arg9[%c0_25, %c0_26] : memref<1x64xf32, #tpu.memory_space<vmem>>, vector<1x64xf32>
    %41 = vector.broadcast %40 : vector<1x64xf32> to vector<16x64xf32>
    %42 = arith.addf %39, %41 : vector<16x64xf32>
    %cst_27 = arith.constant 0.000000e+00 : f32
    %43 = vector.broadcast %cst_27 : f32 to vector<16x64xf32>
    %44 = arith.maximumf %42, %43 : vector<16x64xf32>
    %c0_28 = arith.constant 0 : index
    %c0_29 = arith.constant 0 : index
    %45 = vector.load %arg10[%c0_28, %c0_29] : memref<64x32xf32, #tpu.memory_space<vmem>>, vector<64x32xf32>
    %cst_30 = arith.constant dense<0.000000e+00> : vector<16x32xf32>
    %46 = tpu.matmul %44, %45, %cst_30 {dimension_numbers = #tpu.dot_dimension_numbers<[1], [0], [0], [1], [0, 0, 1, 1], [], []>} : vector<16x64xf32>, vector<64x32xf32>, vector<16x32xf32> -> vector<16x32xf32>
    %c0_31 = arith.constant 0 : index
    %c0_32 = arith.constant 0 : index
    %47 = vector.load %arg11[%c0_31, %c0_32] : memref<1x32xf32, #tpu.memory_space<vmem>>, vector<1x32xf32>
    %48 = vector.broadcast %47 : vector<1x32xf32> to vector<16x32xf32>
    %49 = arith.addf %46, %48 : vector<16x32xf32>
    %50 = arith.addf %37, %49 : vector<16x32xf32>
    %c0_33 = arith.constant 0 : index
    %c0_34 = arith.constant 0 : index
    %51 = vector.load %arg12[%c0_33, %c0_34] : memref<1x32xf32, #tpu.memory_space<vmem>>, vector<1x32xf32>
    %c0_35 = arith.constant 0 : index
    %c0_36 = arith.constant 0 : index
    %52 = vector.load %arg13[%c0_35, %c0_36] : memref<1x32xf32, #tpu.memory_space<vmem>>, vector<1x32xf32>
    %cst_37 = arith.constant dense<0.000000e+00> : vector<16xf32>
    %53 = vector.multi_reduction <add>, %50, %cst_37 [1] : vector<16x32xf32> to vector<16xf32>
    %54 = vector.shape_cast %53 : vector<16xf32> to vector<16x1xf32>
    %cst_38 = arith.constant 3.125000e-02 : f32
    %55 = vector.broadcast %cst_38 : f32 to vector<16x1xf32>
    %56 = arith.mulf %54, %55 : vector<16x1xf32>
    %57 = vector.broadcast %56 : vector<16x1xf32> to vector<16x32xf32>
    %58 = arith.subf %50, %57 : vector<16x32xf32>
    %59 = arith.mulf %58, %58 : vector<16x32xf32>
    %cst_39 = arith.constant dense<0.000000e+00> : vector<16xf32>
    %60 = vector.multi_reduction <add>, %59, %cst_39 [1] : vector<16x32xf32> to vector<16xf32>
    %61 = vector.shape_cast %60 : vector<16xf32> to vector<16x1xf32>
    %cst_40 = arith.constant 3.125000e-02 : f32
    %62 = vector.broadcast %cst_40 : f32 to vector<16x1xf32>
    %63 = arith.mulf %61, %62 : vector<16x1xf32>
    %cst_41 = arith.constant 9.99999974E-6 : f32
    %64 = vector.broadcast %cst_41 : f32 to vector<16x1xf32>
    %65 = arith.addf %63, %64 : vector<16x1xf32>
    %66 = math.rsqrt %65 : vector<16x1xf32>
    %67 = vector.broadcast %66 : vector<16x1xf32> to vector<16x32xf32>
    %68 = arith.mulf %58, %67 : vector<16x32xf32>
    %69 = vector.broadcast %51 : vector<1x32xf32> to vector<16x32xf32>
    %70 = arith.mulf %68, %69 : vector<16x32xf32>
    %71 = vector.broadcast %52 : vector<1x32xf32> to vector<16x32xf32>
    %72 = arith.addf %70, %71 : vector<16x32xf32>
    %c0_42 = arith.constant 0 : index
    %c0_43 = arith.constant 0 : index
    %c0_44 = arith.constant 0 : index
    %73 = vector.load %arg14[%c0_42, %c0_43, %c0_44] : memref<1x16x32xf32, #tpu.memory_space<vmem>>, vector<1x16x32xf32>
    %74 = vector.shape_cast %73 : vector<1x16x32xf32> to vector<16x32xf32>
    %75 = vector.shape_cast %72 : vector<16x32xf32> to vector<1x16x32xf32>
    tpu.vector_store %arg14[%c0_42, %c0_43, %c0_44], %75 {strides = array<i32>} : memref<1x16x32xf32, #tpu.memory_space<vmem>>, vector<1x16x32xf32>,
    return
  }
  func.func @transform_0(%arg0: i32) -> (i32, i32, i32) {
    %c0_i32 = arith.constant 0 : i32
    %c0_i32_0 = arith.constant 0 : i32
    %c0_i32_1 = arith.constant 0 : i32
    return %arg0, %c0_i32, %c0_i32_0 : i32, i32, i32
  }
  func.func @transform_1(%arg0: i32) -> (i32, i32) {
    %c0_i32 = arith.constant 0 : i32
    %c0_i32_0 = arith.constant 0 : i32
    %c0_i32_1 = arith.constant 0 : i32
    return %c0_i32, %c0_i32_0 : i32, i32
  }
  func.func @transform_2(%arg0: i32) -> (i32, i32) {
    %c0_i32 = arith.constant 0 : i32
    %c0_i32_0 = arith.constant 0 : i32
    %c0_i32_1 = arith.constant 0 : i32
    return %c0_i32, %c0_i32_0 : i32, i32
  }
  func.func @transform_3(%arg0: i32) -> (i32, i32) {
    %c0_i32 = arith.constant 0 : i32
    %c0_i32_0 = arith.constant 0 : i32
    %c0_i32_1 = arith.constant 0 : i32
    return %c0_i32, %c0_i32_0 : i32, i32
  }
  func.func @transform_4(%arg0: i32) -> (i32, i32) {
    %c0_i32 = arith.constant 0 : i32
    %c0_i32_0 = arith.constant 0 : i32
    %c0_i32_1 = arith.constant 0 : i32
    return %c0_i32, %c0_i32_0 : i32, i32
  }
  func.func @transform_5(%arg0: i32) -> (i32, i32) {
    %c0_i32 = arith.constant 0 : i32
    %c0_i32_0 = arith.constant 0 : i32
    %c0_i32_1 = arith.constant 0 : i32
    return %c0_i32, %c0_i32_0 : i32, i32
  }
  func.func @transform_6(%arg0: i32) -> (i32, i32) {
    %c0_i32 = arith.constant 0 : i32
    %c0_i32_0 = arith.constant 0 : i32
    %c0_i32_1 = arith.constant 0 : i32
    return %c0_i32, %c0_i32_0 : i32, i32
  }
  func.func @transform_7(%arg0: i32) -> (i32, i32) {
    %c0_i32 = arith.constant 0 : i32
    %c0_i32_0 = arith.constant 0 : i32
    %c0_i32_1 = arith.constant 0 : i32
    return %c0_i32, %c0_i32_0 : i32, i32
  }
  func.func @transform_8(%arg0: i32) -> (i32, i32) {
    %c0_i32 = arith.constant 0 : i32
    %c0_i32_0 = arith.constant 0 : i32
    %c0_i32_1 = arith.constant 0 : i32
    return %c0_i32, %c0_i32_0 : i32, i32
  }
  func.func @transform_9(%arg0: i32) -> (i32, i32) {
    %c0_i32 = arith.constant 0 : i32
    %c0_i32_0 = arith.constant 0 : i32
    %c0_i32_1 = arith.constant 0 : i32
    return %c0_i32, %c0_i32_0 : i32, i32
  }
  func.func @transform_10(%arg0: i32) -> (i32, i32) {
    %c0_i32 = arith.constant 0 : i32
    %c0_i32_0 = arith.constant 0 : i32
    %c0_i32_1 = arith.constant 0 : i32
    return %c0_i32, %c0_i32_0 : i32, i32
  }
  func.func @transform_11(%arg0: i32) -> (i32, i32) {
    %c0_i32 = arith.constant 0 : i32
    %c0_i32_0 = arith.constant 0 : i32
    %c0_i32_1 = arith.constant 0 : i32
    return %c0_i32, %c0_i32_0 : i32, i32
  }
  func.func @transform_12(%arg0: i32) -> (i32, i32) {
    %c0_i32 = arith.constant 0 : i32
    %c0_i32_0 = arith.constant 0 : i32
    %c0_i32_1 = arith.constant 0 : i32
    return %c0_i32, %c0_i32_0 : i32, i32
  }
  func.func @transform_13(%arg0: i32) -> (i32, i32, i32) {
    %c0_i32 = arith.constant 0 : i32
    %c0_i32_0 = arith.constant 0 : i32
    %c0_i32_1 = arith.constant 0 : i32
    return %arg0, %c0_i32, %c0_i32_0 : i32, i32, i32
  }
}

</mosaic_0001>

<bundles_post_ra>
// kernel: tpu_custom_call.1
= control target key start
LH: loop header
LB: loop body
LE: loop exit
PB: predicated region body
PF: predicated region fallthrough
CT: control target
= control target key end

     0   :  { %s1548_s0 = inlined_call_operand.vmem [shape: f32[2,16,32], index: 0, kind: input, shape index: {}]   ;;  %s1549_s1 = inlined_call_operand.vmem [shape: f32[32,32], index: 1, kind: input, shape index: {}]   ;;  %s1550_s2 = inlined_call_operand.vmem [shape: f32[1,32], index: 2, kind: input, shape index: {}]   ;;  %s1551_s3 = inlined_call_operand.vmem [shape: f32[32,32], index: 3, kind: input, shape index: {}]   ;;  %s1552_s4 = inlined_call_operand.vmem [shape: f32[1,32], index: 4, kind: input, shape index: {}]   ;;  %s1553_s5 = inlined_call_operand.vmem [shape: f32[1,32], index: 5, kind: input, shape index: {}]   ;;  %s1554_s6 = inlined_call_operand.vmem [shape: f32[1,32], index: 6, kind: input, shape index: {}]   ;;  %s1555_s7 = inlined_call_operand.hbm [shape: f32[32,64], index: 7, kind: input, shape index: {}]   ;;  %s1556_s8 = inlined_call_operand.vmem [shape: f32[1,64], index: 8, kind: input, shape index: {}]   ;;  %s1557_s9 = inlined_call_operand.vmem [shape: f32[64,32], index: 9, kind: input, shape index: {}]   ;;  %s1558_s10 = inlined_call_operand.vmem [shape: f32[1,32], index: 10, kind: input, shape index: {}]   ;;  %s1559_s11 = inlined_call_operand.vmem [shape: f32[1,32], index: 11, kind: input, shape index: {}]   ;;  %s1560_s12 = inlined_call_operand.vmem [shape: f32[1,32], index: 12, kind: input, shape index: {}]   ;;  %s1561_s13 = inlined_call_operand.hbm [shape: f32[2,16,32], index: 13, kind: output, shape index: {}]  }
   0x1   :  { %1563 = sst [smem:[#allocation10_spill]] %s1548_s0 }
   0x2   :  { %1564 = sst [smem:[#allocation11_spill]] %s1555_s7 }
   0x3   :  { %18 = vsyncpa [#allocation3], 0 }
   0x4   :  { %19 = vsyncpa [#allocation4], 0 }
   0x5   :  { %21 = vsyncpa [#allocation4 + $0x1], 0  ;;  %s1340_s25 = smov 0   ;;  %s1342_s26 = smov 0  }
   0x6   :  { %s1344_s27 = smov 0   ;;  %s1346_s28 = smov 0  }
   0x7 LB: > { %1565 = sst [smem:[#allocation8_spill]] %s1256_s27  ;;  %s1361_s29 = sadd.s32 4294967295, %s1260_s28   ;;  %s1260_s28 = sphi %s1346_s28, %s1577_s28   ;;  %s1256_s27 = sphi %s1344_s27, %s1574_s27   ;;  %s1252_s26 = sphi %s1342_s26, %s1576_s26   ;;  %s1248_s25 = sphi %s1340_s25, %s1575_s25  }
   0x8   : > { %s1000_s30 = sadd.s32 4294967294, %s1260_s28   ;;  %s1365_s14 = sadd.s32 1, %s1260_s28  }
   0x9   : > { %s312_s15 = sadd.s32 1, %s1256_s27  ;;  %s309_s16 = ssub.s32 %s1260_s28, %s1365_s14 }
   0xa   : > { %p322_p0 = scmp.ne.s32.totalorder %s1256_s27, %s1252_s26  ;;  %p310_p1 = scmp.eq.s32.totalorder %s309_s16, 0 }
   0xb   : > { %p323_p2 = scmp.eq.s32.totalorder %s1361_s29, 1  ;;  %p328_p3 = scmp.ne.s32.totalorder %s1252_s26, %s1248_s25 }
   0xc   : > { %p329_p4 = scmp.eq.s32.totalorder %s1000_s30, 1  ;;  %p1001_p7 = scmp.ge.s32.totalorder %s1260_s28, 1 }
   0xd   : > { %s1376_s17 = scalar_select %p310_p1, %s1256_s27, %s312_s15  }
   0xe   : > { %p1378_p5 = por %p323_p2, %p322_p0  ;;  %p1382_p6 = por %p329_p4, %p328_p3 }
   0xf   : > { %1566 = sst [smem:[#allocation9_spill]] %s1376_s17  ;;  %p336_p8 = scmp.lt.s32.totalorder %s1260_s28, 3 }
  0x10   : > { %s1568_s19 = scalar_select %p1382_p6, 1, 0 }
  0x11   : > { %p1120_p9 = scmp.eq.s32.totalorder %s1361_s29, 0  ;;  %p1389_p10 = pnand %p1001_p7, %p336_p8 }
  0x12   : > { %s1262_s21 = smov [#allocation2]  }
  0x13   : > { %s366_s22 = sshll.u32 %s1262_s21, 4  ;;  %p1112_p11 = pneg %p1389_p10  ;;  %s367_s22 = int_to_ptr.vmem [resolvable:$true] %s366_s22 }
  0x14   : > { %s1181_s23 = scalar_lea.vmem %s367_s22, 512  ;;  %p1189_p3 = scmp.lt.s32.totalorder %s367_s22, %s367_s22 }
  0x15   : > { %p1113_p12 = pnand %p1120_p9, %p1112_p11  ;;  %p1182_p0 = scmp.ne.s32.totalorder %s367_s22, %s1181_s23 }
  0x16   : > { %p1190_p4 = scmp.lt.s32.totalorder %s1181_s23, %s1181_s23 }
  0x17   : > { %p1172_p13 = pneg %p1113_p12 }
  0x18   : > { %p1191_p6 = por %p1190_p4, %p1189_p3 }
  0x19   : > { %p1184_p1 = pnand %p1182_p0, %p1172_p13 }
  0x1b   : > { %p1185_p2 = pneg %p1184_p1 }
  0x1d   : > { %p1192_p7 = pnand %p1191_p6, %p1185_p2 }
  0x1f   : > { %1195 = shalt.err (!%p1192_p7)
}
  0x20   : > { %s1263_s24 = smov 128   ;;  %s1264_s30 = smov 8  }
  0x21   : > { %s1570_s7 = sld [smem:[#allocation11_spill]] }
  0x23   : > { %405 = sbr.rel (%p1389_p10) target bundleno = 1491 (0x5d3), region = 72 }
  0x27   : > { %1115 = dma.hbm_to_vmem [thread:$0]  (!%p1113_p12), %s1570_s7, 512, %s367_s22, [#allocation3], %s1263_s24, %s1263_s24, %s1264_s30  }
  0x28   : > { %1239 = dma.done.wait (%p1120_p9), [#allocation3], 512  }
  0x29   : > { %1241 = vsyncadd (%p1120_p9), [#allocation3], 4294966784  ;;  %p449_p8 = scmp.lt.s32.totalorder %s1361_s29, 1  ;;  %v1265_v0 = vmov 0.0   ;;  %vm1266_vm0 = vmmov 0   ;;  %s1571_s0 = sld [smem:[#allocation10_spill]]  ;;  %v623_v25 = vlaneseq }
  0x2a   : > { %1054 = vmatprep.subr.mxu0 %v1265_v0  ;;  %1062 = vmatprep.mubr.msk.f32.mxu0 %vm1266_vm0, %v1265_v0  ;;  %vm456_vm1 = vcmask 261120   ;;  %v469_v1 = vld [vmem:[%s1549_s1 + $0x18] sm:$0xff]  ;;  %v468_v2 = vld [vmem:[%s1549_s1 + $0x10] sm:$0xff]  ;;  %v467_v5 = vld [vmem:[%s1549_s1 + $0x8] sm:$0xff]  ;;  %vm782_vm2 = vcmask 523264   ;;  %s1267_s17 = smov [#allocation5]  }
  0x2b   : > { %s450_s21 = scalar_select %p449_p8, %s1361_s29, 1  ;;  %1065 = vmatprep.subr.mxu1 %v1265_v0  ;;  %1073 = vmatprep.mubr.msk.f32.mxu1 %vm1266_vm0, %v1265_v0  ;;  %v548_v8 = vld [vmem:[%s1551_s3 + $0x18] sm:$0xff]  ;;  %v547_v9 = vld [vmem:[%s1551_s3 + $0x10] sm:$0xff]  ;;  %v466_v11 = vld [vmem:[%s1549_s1] sm:$0xff]  ;;  %v624_v26 = vshrl.u32 %v623_v25, 7 }
  0x2c   : > { %1055 = vmatpush3.msra.mxu0 %v469_v1  ;;  %1066 = vmatpush3.msra.mxu1 %v548_v8  ;;  %v546_v18 = vld [vmem:[%s1551_s3 + $0x8] sm:$0xff]  ;;  %v545_v19 = vld [vmem:[%s1551_s3] sm:$0xff]  ;;  %v676_v47 = vld [vmem:[#allocation2 + $0x18] sm:$0xff]  ;;  %s1200_s30 = sshll.u32 %s1267_s17, 4  ;;  %s1201_s30 = int_to_ptr.vmem [resolvable:$false] %s1200_s30 }
  0x2d   : > { %s1026_s22 = sshll.u32 %s450_s21, 4  ;;  %1056 = vmatprep.subr.mxu0 %v1265_v0  ;;  %1067 = vmatprep.subr.mxu1 %v1265_v0  ;;  %v470_v20 = vld [vmem:[%s1550_s2] sm:$0x1]  ;;  %v625_v28 = vsub.s32 0, %v624_v26  ;;  %v675_v48 = vld [vmem:[#allocation2 + $0x10] sm:$0xff]  ;;  %v674_v49 = vld [vmem:[#allocation2 + $0x8] sm:$0xff] }
  0x2e   : > { %1057 = vmatpush3.msra.mxu0 %v468_v2  ;;  %1068 = vmatpush3.msra.mxu1 %v547_v9  ;;  %v471_v21 = vmul.f32 16.0, %v470_v20  ;;  %v549_v27 = vld [vmem:[%s1552_s4] sm:$0x1]  ;;  %v774_v51 = vld [vmem:[%s1557_s9 + $0x38] sm:$0xff]  ;;  %v773_v52 = vld [vmem:[%s1557_s9 + $0x30] sm:$0xff]  ;;  %s1027_s21 = sshll.u32 %s1361_s29, 8 }
  0x2f   : > { %s453_s24 = scalar_lea.vmem %s1571_s0, %s1026_s22  ;;  %1058 = vmatprep.subr.mxu0 %v1265_v0  ;;  %1069 = vmatprep.subr.mxu1 %v1265_v0  ;;  %v673_v50 = vld [vmem:[#allocation2] sm:$0xff]  ;;  %v772_v53 = vld [vmem:[%s1557_s9 + $0x28] sm:$0xff]  ;;  %v769_v8 = vld [vmem:[%s1557_s9 + $0x10] sm:$0xff]  ;;  %s1502_s0 = scalar_lea.hbm %s1561_s13, %s1027_s21 }
  0x30   : > { %v454_v3 = vld [vmem:[%s453_s24] sm:$0xff]  ;;  %v455_v4 = vld [vmem:[%s453_s24 + $0x8] sm:$0xff]  ;;  %1059 = vmatpush3.msra.mxu0 %v467_v5  ;;  %1070 = vmatpush3.msra.mxu1 %v546_v18  ;;  %s446_s24 = sand.u32 1, %s1252_s26   ;;  %s1202_s15 = scalar_lea.vmem %s1201_s30, 512 }
  0x31   : > { %v457_v6 = vsel %vm456_vm1, %v454_v3, 0.0  ;;  %v458_v7 = vsel %vm456_vm1, %v455_v4, 0.0  ;;  %1060 = vmatprep.subr.mxu0 %v1265_v0  ;;  %1071 = vmatprep.subr.mxu1 %v1265_v0  ;;  %v771_v54 = vld [vmem:[%s1557_s9 + $0x20] sm:$0xff]  ;;  %v768_v9 = vld [vmem:[%s1557_s9 + $0x8] sm:$0xff]  ;;  %s1006_s27 = sshll.u32 %s446_s24, 4  ;;  %s1508_s29 = scalar_lea.sflag [#allocation4], %s446_s24 }
  0x32   : > { %v459_v10 = vadd.f32 %v458_v7, %v457_v6  ;;  %1061 = vmatpush3.msra.mxu0 %v466_v11  ;;  %1072 = vmatpush3.msra.mxu1 %v545_v19  ;;  %v1011_v62 = vld [vmem:[%s1553_s5] ss:$0 sm:$0xff]  ;;  %v770_v7 = vld [vmem:[%s1557_s9 + $0x18] sm:$0xff]  ;;  %s448_s22 = scalar_lea.vmem [#allocation5], %s1006_s27 }
  0x33   : > { %1076 = vmatprep.subr.mxu0 %v676_v47  ;;  %1087 = vmatprep.subr.mxu1 %v774_v51  ;;  %v1012_v0 = vld [vmem:[%s1554_s6] ss:$0 sm:$0xff]  ;;  %s926_s23 = sshll.u32 %s448_s22, 4  ;;  %s1504_s23 = int_to_ptr.vmem [resolvable:$true] %s926_s23 }
  0x34   : > { %v460_v12 = vrot.slane %v459_v10, 4  ;;  %v1013_v11 = vld [vmem:[%s1556_s8] ss:$0 sm:$0xff]  ;;  %s1196_s27 = scalar_lea.vmem %s1504_s23, 256  ;;  %p1203_p11 = scmp.lt.s32.totalorder %s1504_s23, %s1201_s30 }
  0x35   : > { %v1016_v18 = vld [vmem:[%s1558_s10] ss:$0 sm:$0xff]  ;;  %p1197_p6 = scmp.ne.s32.totalorder %s1504_s23, %s1196_s27  ;;  %p1204_p12 = scmp.lt.s32.totalorder %s1202_s15, %s1196_s27 }
  0x36   : > { %v461_v13 = vadd.f32 %v460_v12, %v459_v10  ;;  %v767_v10 = vld [vmem:[%s1557_s9] sm:$0xff] }
  0x37   : > { %p1198_p9 = pnand %p1197_p6, %p1378_p5  ;;  %p1205_p13 = por %p1204_p12, %p1203_p11 }
  0x38   : > { %v462_v14 = vrot.slane %v461_v13, 2 }
  0x39   : > { %p1199_p10 = pneg %p1198_p9 }
  0x3a   : > { %v463_v15 = vadd.f32 %v462_v14, %v461_v13 }
  0x3b   : > { %p1206_p0 = pnand %p1205_p13, %p1199_p10 }
  0x3c   : > { %v464_v16 = vrot.slane %v463_v15, 1 }
  0x3e   : > { %v465_v17 = vadd.f32 %v464_v16, %v463_v15 }
  0x40   : > { %1063 = vmatmul.mubr.msk.f32.vlgmr.msra.gmra.mxu0 %vm456_vm1, %v465_v17 }
  0x41   : > { %1077 = vmatpush3.msra.mxu0 %v676_v47  ;;  %v1020_v47 = vld [vmem:[%s1560_s12] ss:$0 sm:$0xff] }
  0x42   : > { %1078 = vmatprep.subr.mxu0 %v675_v48 }
  0x43   : > { %1079 = vmatpush3.msra.mxu0 %v675_v48 }
  0x44   : > { %1080 = vmatprep.subr.mxu0 %v674_v49 }
  0x45   : > { %1081 = vmatpush3.msra.mxu0 %v674_v49 }
  0x46   : > { %1082 = vmatprep.subr.mxu0 %v673_v50 }
  0x47   : > { %1083 = vmatpush3.msra.mxu0 %v673_v50 }
 0x100   : > { %v541_v22 = vpop.f32.mrf.mxu0 }
 0x101   : > { %v542_v23 = vadd.f32 %v541_v22, %v471_v21 }
 0x102   : > { %v1064_v24 = vpop.f32.mrf.mxu0 }
 0x103   : > { %1074 = vmatmul.mubr.msk.f32.vlgmr.msra.gmra.mxu1 %vm456_vm1, %v542_v23 }
 0x104   : > { %1088 = vmatpush3.msra.mxu1 %v774_v51 }
 0x105   : > { %1089 = vmatprep.subr.mxu1 %v773_v52 }
 0x106   : > { %1090 = vmatpush3.msra.mxu1 %v773_v52 }
 0x107   : > { %1091 = vmatprep.subr.mxu1 %v772_v53 }
 0x108   : > { %1092 = vmatpush3.msra.mxu1 %v772_v53 }
 0x109   : > { %1093 = vmatprep.subr.mxu1 %v771_v54 }
 0x10a   : > { %1094 = vmatpush3.msra.mxu1 %v771_v54 }
 0x10b   : > { %1095 = vmatprep.subr.mxu1 %v770_v7 }
 0x10c   : > { %1096 = vmatpush3.msra.mxu1 %v770_v7 }
 0x10d   : > { %1097 = vmatprep.subr.mxu1 %v769_v8 }
 0x10e   : > { %1098 = vmatpush3.msra.mxu1 %v769_v8 }
 0x10f   : > { %1099 = vmatprep.subr.mxu1 %v768_v9 }
 0x110   : > { %1100 = vmatpush3.msra.mxu1 %v768_v9 }
 0x111   : > { %1101 = vmatprep.subr.mxu1 %v767_v10 }
 0x112   : > { %1102 = vmatpush3.msra.mxu1 %v767_v10 }
 0x1c3   : > { %v619_v29 = vpop.f32.mrf.mxu1 }
 0x1c4   : > { %v620_v30 = vadd.f32 %v619_v29, %v549_v27 }
 0x1c5   : > { %v1075_v31 = vpop.f32.mrf.mxu1 }
 0x1c6   : > { %v626_v32 = vrot.slane %v620_v30, %v625_v28 }
 0x1c8   : > { %v627_v33 = vadd.f32 %v626_v32, %v454_v3  ;;  %v628_v35 = vadd.f32 %v626_v32, %v455_v4 }
 0x1ca   : > { %v631_v34 = vsel %vm456_vm1, %v627_v33, 0.0  ;;  %v634_v36 = vsel %vm456_vm1, %v628_v35, 0.0 }
 0x1cb   : > { %632 = vadd.xlane.f32.xlu0 %v631_v34 }
 0x1cf   : > { %635 = vadd.xlane.f32.xlu0 %v634_v36 }
 0x254   : > { %v633_v37 = vpop.xlane.xlu0 %632 }
 0x255   : > { %v637_v38 = vmul.f32 0.03125, %v633_v37 }
 0x257   : > { %v639_v39 = vsub.f32 %v627_v33, %v637_v38 }
 0x258   : > { %v636_v40 = vpop.xlane.xlu0 %635 }
 0x259   : > { %v638_v41 = vmul.f32 0.03125, %v636_v40  ;;  %v641_v42 = vmul.f32 %v639_v39, %v639_v39 }
 0x25b   : > { %v640_v43 = vsub.f32 %v628_v35, %v638_v41  ;;  %v643_v44 = vsel %vm456_vm1, %v641_v42, 0.0 }
 0x25c   : > { %644 = vadd.xlane.f32.xlu1 %v643_v44  ;;  %v1019_v44 = vld [vmem:[%s1559_s11] ss:$0 sm:$0xff] }
 0x25d   : > { %v642_v45 = vmul.f32 %v640_v43, %v640_v43 }
 0x25f   : > { %v646_v46 = vsel %vm456_vm1, %v642_v45, 0.0 }
 0x260   : > { %647 = vadd.xlane.f32.xlu1 %v646_v46 }
 0x2e5   : > { %v645_v55 = vpop.xlane.xlu1 %644 }
 0x2e6   : > { %v649_v56 = vmul.f32 0.03125, %v645_v55 }
 0x2e8   : > { %v651_v57 = vadd.f32 1e-05, %v649_v56 }
 0x2e9   : > { %v648_v58 = vpop.xlane.xlu1 %647 }
 0x2ea   : > { %1162 = vrsqrt.f32 %v651_v57  ;;  %v650_v59 = vmul.f32 0.03125, %v648_v58 }
 0x2ec   : > { %v652_v60 = vadd.f32 1e-05, %v650_v59 }
 0x2ee   : > { %1164 = vrsqrt.f32 %v652_v60 }
 0x2f7   : > { %v1163_v61 = vpop.eup %1162 }
 0x2f8   : > { %v655_v63 = vmul.f32 %v1163_v61, %v639_v39 }
 0x2fa   : > { %v663_v1 = vmul.f32 %v1011_v62, %v655_v63 }
 0x2fb   : > { %v1165_v2 = vpop.eup %1164 }
 0x2fc   : > { %v656_v3 = vmul.f32 %v1165_v2, %v640_v43  ;;  %v671_v4 = vadd.f32 %v1012_v0, %v663_v1 }
 0x2fe   : > { %v664_v5 = vmul.f32 %v1011_v62, %v656_v3  ;;  %1084 = vmatprep.mubr.msk.f32.mxu0 %vm456_vm1, %v671_v4 }
 0x300   : > { %v672_v6 = vadd.f32 %v1012_v0, %v664_v5 }
 0x302   : > { %1085 = vmatmul.mubr.msk.f32.vlgmr.msra.gmra.mxu0 %vm456_vm1, %v672_v6 }
 0x3c2   : > { %v1086_v12 = vpop.f32.mrf.mxu0 }
 0x3c3   : > { %v762_v13 = vadd.f32 %v1086_v12, %v1013_v11 }
 0x3c4   : > { %v756_v14 = vpop.f32.mrf.mxu0 }
 0x3c5   : > { %v757_v15 = vadd.f32 %v1013_v11, %v756_v14  ;;  %v766_v17 = vmax.f32 %v762_v13, 0.0 }
 0x3c7   : > { %v765_v16 = vmax.f32 %v757_v15, 0.0 }
 0x3c9   : > { %1103 = vmatprep.mubr.msk.f32.mxu1 %vm782_vm2, %v765_v16 }
 0x3ca   : > { %1104 = vmatmul.mubr.msk.f32.vlgmr.msra.gmra.mxu1 %vm782_vm2, %v766_v17 }
 0x48a   : > { %v1105_v19 = vpop.f32.mrf.mxu1 }
 0x48b   : > { %v861_v20 = vadd.f32 %v1105_v19, %v1016_v18 }
 0x48c   : > { %v855_v21 = vpop.f32.mrf.mxu1 }
 0x48d   : > { %v856_v22 = vadd.f32 %v1016_v18, %v855_v21  ;;  %v865_v23 = vadd.f32 %v861_v20, %v672_v6 }
 0x48f   : > { %v871_v24 = vsel %vm456_vm1, %v865_v23, 0.0  ;;  %v864_v25 = vadd.f32 %v856_v22, %v671_v4 }
 0x490   : > { %872 = vadd.xlane.f32.xlu1 %v871_v24 }
 0x491   : > { %v868_v26 = vsel %vm456_vm1, %v864_v25, 0.0 }
 0x492   : > { %869 = vadd.xlane.f32.xlu0 %v868_v26 }
 0x519   : > { %v873_v27 = vpop.xlane.xlu1 %872 }
 0x51a   : > { %v875_v28 = vmul.f32 0.03125, %v873_v27 }
 0x51b   : > { %v870_v29 = vpop.xlane.xlu0 %869 }
 0x51c   : > { %v877_v30 = vsub.f32 %v865_v23, %v875_v28  ;;  %v874_v31 = vmul.f32 0.03125, %v870_v29 }
 0x51e   : > { %v876_v32 = vsub.f32 %v864_v25, %v874_v31  ;;  %v879_v33 = vmul.f32 %v877_v30, %v877_v30 }
 0x520   : > { %v883_v34 = vsel %vm456_vm1, %v879_v33, 0.0  ;;  %v878_v35 = vmul.f32 %v876_v32, %v876_v32 }
 0x521   : > { %884 = vadd.xlane.f32.xlu1 %v883_v34 }
 0x522   : > { %v880_v36 = vsel %vm456_vm1, %v878_v35, 0.0 }
 0x523   : > { %881 = vadd.xlane.f32.xlu0 %v880_v36 }
 0x5aa   : > { %v885_v37 = vpop.xlane.xlu1 %884 }
 0x5ab   : > { %v887_v38 = vmul.f32 0.03125, %v885_v37 }
 0x5ac   : > { %v882_v39 = vpop.xlane.xlu0 %881 }
 0x5ad   : > { %v889_v40 = vadd.f32 1e-05, %v887_v38  ;;  %v886_v41 = vmul.f32 0.03125, %v882_v39 }
 0x5af   : > { %1166 = vrsqrt.f32 %v889_v40  ;;  %v888_v42 = vadd.f32 1e-05, %v886_v41 }
 0x5b1   : > { %1168 = vrsqrt.f32 %v888_v42 }
 0x5bc   : > { %v1167_v43 = vpop.eup %1166 }
 0x5bd   : > { %v893_v45 = vmul.f32 %v1167_v43, %v877_v30 }
 0x5be   : > { %v1169_v46 = vpop.eup %1168 }
 0x5bf   : > { %v901_v48 = vmul.f32 %v1019_v44, %v893_v45  ;;  %v892_v49 = vmul.f32 %v1169_v46, %v876_v32 }
 0x5c1   : > { %v909_v50 = vadd.f32 %v1020_v47, %v901_v48  ;;  %v900_v51 = vmul.f32 %v1019_v44, %v892_v49 }
 0x5c3   : > { %v908_v52 = vadd.f32 %v1020_v47, %v900_v51  ;;  %911 = vst.msk [vmem:[%s448_s22 + $0x8] sm:$0xff] %vm456_vm1, %v909_v50 }
 0x5c5   : > { %910 = vst.msk [vmem:[%s448_s22] sm:$0xff] %vm456_vm1, %v908_v52 }
 0x5c6   : > { %1209 = shalt.err (!%p1206_p0)
}
 0x5c7   : > { %s1210_s24 = scalar_lea.hbm %s1502_s0, 256  ;;  %s1214_s22 = scalar_lea.hbm %s1561_s13, 512 }
 0x5c8   : > { %p1211_p1 = scmp.ne.s32.totalorder %s1502_s0, %s1210_s24  ;;  %p1215_p4 = scmp.lt.s32.totalorder %s1502_s0, %s1561_s13 }
 0x5c9   : > { %p1216_p7 = scmp.lt.s32.totalorder %s1214_s22, %s1210_s24 }
 0x5ca   : > { %p1212_p2 = pnand %p1211_p1, %p1378_p5 }
 0x5cb   : > { %p1217_p8 = por %p1216_p7, %p1215_p4 }
 0x5cc   : > { %p1213_p3 = pneg %p1212_p2 }
 0x5ce   : > { %p1218_p6 = pnand %p1217_p8, %p1213_p3 }
 0x5d0   : > { %1221 = shalt.err (!%p1218_p6)
}
 0x5d1   : > { %s1268_s27 = smov 128   ;;  %s1269_s17 = smov 8  }
 0x5d2   : > { %1110 = dma.vmem_to_hbm [thread:$0]  (%p1378_p5), %s1504_s23, 256, %s1502_s0, %s1508_s29, %s1268_s27, %s1268_s27, %s1269_s17  }
 0x5d3 PF: > { %p1122_p9 = scmp.ge.s32.totalorder %s1260_s28, 2  ;;  %s941_s30 = sand.u32 1, %s1248_s25  }
 0x5d4   : > { %p1572_p10 = scmp.ne.s32.totalorder %s1568_s19, 0  ;;  %s942_s15 = scalar_lea.sflag [#allocation4], %s941_s30 }
 0x5d6   : > { %p1117_p11 = pnand %p1122_p9, %p1572_p10 }
 0x5d8   : > { %p1118_p12 = pneg %p1117_p11 }
 0x5da   : > { %1243 = dma.done.wait (%p1118_p12), %s942_s15, 256  }
 0x5db   : > { %1245 = vsyncadd (%p1118_p12), %s942_s15, 4294967040  ;;  %s1573_s24 = sld [smem:[#allocation8_spill]]  ;;  %p24_p13 = scmp.ge.s32.totalorder %s1365_s14, 4  }
 0x5dc   : > { %s1574_s27 = sld [smem:[#allocation9_spill]]  ;;  %s1575_s25 = smov %s1252_s26 }
 0x5dd   : > { %s1577_s28 = smov %s1365_s14  ;;  %26 = sbr.rel (!%p24_p13) target bundleno = 7 (0x7), region = 112 }
 0x5e1   : > { %s1576_s26 = smov %s1573_s24 }
 0x5e2   :  { %947 = vsyncpa [#allocation3], 1 }
 0x5e3   :  { %949 = vsyncpa [#allocation3 + $0x1], 1 }
 0x5e4   :  { %950 = vsyncpa [#allocation4], 1 }
 0x5e5   :  { %952 = vsyncpa [#allocation4 + $0x1], 1 }

</bundles_post_ra>
